<compile_context>
chip_gen: v5e
topology: v5e:2x2
jax: 0.10.0
libtpu: 0.0.40
codegen_flags: <defaults>
</compile_context>

<pallas_src>
import functools
import math

import jax
import jax.numpy as jnp
from jax.experimental import pallas as pl
from jax.experimental.pallas import tpu as pltpu


_LANE = 128
_NUM_SPLITS = 2                          # leading "parallel" grid axis (2 TCs on v7x)
_TARGET_BLOCK_BYTES = 2 * 1024 * 1024    # ~2 MiB per input block (native dtype)
_VMEM_LIMIT_BYTES = 32 * 1024 * 1024     # explicit scoped-VMEM budget, safe on v5e..v7x


def _round_up(x, m):
    return ((x + m - 1) // m) * m


def _cdiv(a, b):
    return -(-a // b)


def _choose_view(shape):
    """Lane-dense 2-D view (R, L) of the tensor requiring NO padding."""
    n = int(math.prod(shape)) if len(shape) else 1
    for cand in (2048, 1024, 512, 256, 128):
        if n % cand == 0:
            return n // cand, cand
    # Ragged fallback: collapse leading dims, keep the (non-128-multiple) last
    # dim as a full-width lane block; tail rows are masked inside the kernel.
    # TODO(synk): tile very large ragged last dims instead of one full-C block.
    if len(shape) >= 2:
        return n // int(shape[-1]), int(shape[-1])
    return 1, n


def _block_rows(R, L, itemsize):
    rows = max(8, (_TARGET_BLOCK_BYTES // max(1, L * itemsize)) // 8 * 8)
    return min(_round_up(R, 8), rows)


def _mse_reduce_kernel(x_ref, y_ref, o_ref, acc_ref, *, factor, rows_total,
                       block_rows, blocks_per_split, mask_rows):
    c = pl.program_id(0)          # megacore split ("parallel")
    k = pl.program_id(1)          # streaming/reduction steps ("arbitrary")

    @pl.when(k == 0)
    def _():
        acc_ref[...] = jnp.zeros_like(acc_ref)

    d = x_ref[...].astype(jnp.float32) - y_ref[...].astype(jnp.float32)
    sq = d * d
    if mask_rows:
        # Zero rows past the logical end (ragged tail block / dead split steps).
        row0 = (c * blocks_per_split + k) * block_rows
        rows = row0 + jax.lax.broadcasted_iota(jnp.int32, sq.shape, 0)
        sq = jnp.where(rows < rows_total, sq, 0.0)

    # Fold the (TR, L) tile into a small (8, L) strip: pure VPU adds, tiny scratch,
    # and a short cross-lane reduce only once in the finalize branch.
    nsub = block_rows // 8
    acc_ref[...] += jnp.sum(sq.reshape(nsub, 8, sq.shape[-1]), axis=0)

    @pl.when(k == pl.num_programs(1) - 1)
    def _():
        total = jnp.sum(acc_ref[...]) * factor          # single XLU reduce + static factor
        lane = jax.lax.broadcasted_iota(jnp.int32, o_ref.shape, 1)
        o_ref[...] = jnp.where(lane == 0, total, 0.0)   # partial in lane 0, zeros elsewhere


def _sqdiff_kernel(x_ref, y_ref, o_ref, *, inv_scale_sq):
    d = x_ref[...].astype(jnp.float32) - y_ref[...].astype(jnp.float32)
    o_ref[...] = (d * d * inv_scale_sq).astype(o_ref.dtype)


def photo_loss_pallas(inp, tgt, scale=1.0, reduction="mean"):
    assert inp.shape == tgt.shape, "input/target shape mismatch"
    assert reduction in ("mean", "sum", "none")

    orig_shape = inp.shape
    out_dtype = jnp.result_type(inp.dtype, tgt.dtype)
    numel = int(math.prod(orig_shape)) if len(orig_shape) else 1

    R, L = _choose_view(orig_shape)
    # No pad, no astype: stream native dtype, upcast inside the kernel.
    x = inp.reshape(R, L)
    y = tgt.reshape(R, L)

    itemsize = max(jnp.dtype(inp.dtype).itemsize, jnp.dtype(tgt.dtype).itemsize)
    TR = _block_rows(R, L, itemsize)
    nblocks = _cdiv(R, TR)
    inv_s2 = float(1.0 / (scale * scale))

    if reduction == "none":
        kernel = functools.partial(_sqdiff_kernel, inv_scale_sq=inv_s2)
        out = pl.pallas_call(
            kernel,
            out_shape=jax.ShapeDtypeStruct((R, L), out_dtype),
            grid_spec=pltpu.PrefetchScalarGridSpec(
                num_scalar_prefetch=0,
                grid=(nblocks,),
                in_specs=[
                    pl.BlockSpec((TR, L), lambda i: (i, 0)),
                    pl.BlockSpec((TR, L), lambda i: (i, 0)),
                ],
                out_specs=pl.BlockSpec((TR, L), lambda i: (i, 0)),
            ),
            compiler_params=pltpu.CompilerParams(
                dimension_semantics=("parallel",),
                vmem_limit_bytes=_VMEM_LIMIT_BYTES,
            ),
            cost_estimate=pl.CostEstimate(
                flops=3 * numel,
                transcendentals=0,
                bytes_accessed=2 * numel * itemsize
                + numel * jnp.dtype(out_dtype).itemsize,
            ),
        )(x, y)
        return out.reshape(orig_shape)      # exact view: no padding, no slice

    # mean / sum
    factor = inv_s2 / numel if reduction == "mean" else inv_s2
    blocks_per_split = _cdiv(nblocks, _NUM_SPLITS)
    mask_rows = (_NUM_SPLITS * blocks_per_split * TR != R)

    def in_map(c, k):
        # Clamp dead steps of the split onto a valid block; the in-kernel row
        # mask (mask_rows) zeroes their contribution.
        return (jnp.minimum(c * blocks_per_split + k, nblocks - 1), 0)

    kernel = functools.partial(
        _mse_reduce_kernel,
        factor=float(factor),
        rows_total=R,
        block_rows=TR,
        blocks_per_split=blocks_per_split,
        mask_rows=mask_rows,
    )

    partials = pl.pallas_call(
        kernel,
        out_shape=jax.ShapeDtypeStruct((1, _NUM_SPLITS * _LANE), jnp.float32),
        grid_spec=pltpu.PrefetchScalarGridSpec(
            num_scalar_prefetch=0,
            grid=(_NUM_SPLITS, blocks_per_split),
            in_specs=[
                pl.BlockSpec((TR, L), in_map),
                pl.BlockSpec((TR, L), in_map),
            ],
            out_specs=pl.BlockSpec((1, _LANE), lambda c, k: (0, c)),  # per-split resident block
            scratch_shapes=[pltpu.VMEM((8, L), jnp.float32)],
        ),
        compiler_params=pltpu.CompilerParams(
            dimension_semantics=("parallel", "arbitrary"),
            vmem_limit_bytes=_VMEM_LIMIT_BYTES,
        ),
        cost_estimate=pl.CostEstimate(
            flops=3 * numel,
            transcendentals=0,
            bytes_accessed=2 * numel * itemsize + _NUM_SPLITS * _LANE * 4,
        ),
    )(x, y)
    # Only lane 0 of each split's 128-lane block is non-zero -> sum is exact.
    return jnp.sum(partials).astype(out_dtype)


class Photo_Loss:
    def __init__(self, scale=1.0, reduction="mean"):
        assert reduction in ["mean", "sum", "none"], "Unknown or invalid reduction"
        self.scale = scale
        self.reduction = reduction

    def forward(self, input, target):
        return photo_loss_pallas(input, target, scale=self.scale, reduction=self.reduction)

    def __call__(self, input, target):
        return self.forward(input, target)


def _reference(inp, tgt, scale=1.0, reduction="mean"):
    d = (inp / scale - tgt / scale) ** 2
    if reduction == "none":
        return d
    if reduction == "mean":
        return jnp.mean(d)
    return jnp.sum(d)


if __name__ == "__main__":
    key = jax.random.PRNGKey(0)

    # Shape 1: spec shape [B, H, W] = [2, 16, 16]  (numel % 512 == 0 -> flat lane-dense path)
    # Shape 2: ragged [3, 17, 23]                  (fallback view + in-kernel tail masking)
    for shape in ((2, 16, 16), (3, 17, 23)):
        k0, k1, key = jax.random.split(key, 3)
        inp = jax.random.normal(k0, shape, dtype=jnp.float32)
        tgt = jax.random.normal(k1, shape, dtype=jnp.float32)

        for reduction in ("mean", "sum", "none"):
            for scale in (1.0, 2.0):
                loss_fn = Photo_Loss(scale=scale, reduction=reduction)
                out = jax.block_until_ready(loss_fn(inp, tgt))
                ref = _reference(inp, tgt, scale=scale, reduction=reduction)
                assert out.shape == ref.shape, (shape, reduction, out.shape, ref.shape)
                assert jnp.allclose(out, ref, atol=1e-4, rtol=1e-5), (
                    shape, reduction, scale, out, ref)

    print("KERNEL_OK")
</pallas_src>

<mosaic_0001>
module attributes {stable_mosaic.version = 11 : i64} {
  func.func @_mse_reduce_kernel(%arg0: i32, %arg1: i32, %arg2: memref<8x512xf32, #tpu.memory_space<vmem>>, %arg3: memref<8x512xf32, #tpu.memory_space<vmem>>, %arg4: memref<1x128xf32, #tpu.memory_space<vmem>>, %arg5: memref<8x512xf32, #tpu.memory_space<vmem>>) attributes {dimension_semantics = [#tpu.dimension_semantics<parallel>, #tpu.dimension_semantics<arbitrary>], iteration_bounds = array<i64: 2, 1>, scalar_prefetch = 0 : i64, scratch_operands = 1 : i64, tpu.core_type = #tpu.core_type<tc>, window_params = [{transform_indices = @transform_0, window_bounds = array<i64: 8, 512>}, {transform_indices = @transform_1, window_bounds = array<i64: 8, 512>}, {transform_indices = @transform_2, window_bounds = array<i64: 1, 128>}]} {
    %c0_i32 = arith.constant 0 : i32
    %0 = arith.cmpi eq, %arg1, %c0_i32 : i32
    %1 = arith.extui %0 : i1 to i32
    %c0_i32_0 = arith.constant 0 : i32
    %2 = arith.cmpi ne, %1, %c0_i32_0 : i32
    scf.if %2 {
      %cst_12 = arith.constant 0.000000e+00 : f32
      %25 = vector.broadcast %cst_12 : f32 to vector<8x512xf32>
      %c0_13 = arith.constant 0 : index
      %c0_14 = arith.constant 0 : index
      %26 = vector.load %arg5[%c0_13, %c0_14] : memref<8x512xf32, #tpu.memory_space<vmem>>, vector<8x512xf32>
      tpu.vector_store %arg5[%c0_13, %c0_14], %25 {strides = array<i32>} : memref<8x512xf32, #tpu.memory_space<vmem>>, vector<8x512xf32>,
    } else {
    }
    %c0 = arith.constant 0 : index
    %c0_1 = arith.constant 0 : index
    %3 = vector.load %arg2[%c0, %c0_1] : memref<8x512xf32, #tpu.memory_space<vmem>>, vector<8x512xf32>
    %c0_2 = arith.constant 0 : index
    %c0_3 = arith.constant 0 : index
    %4 = vector.load %arg3[%c0_2, %c0_3] : memref<8x512xf32, #tpu.memory_space<vmem>>, vector<8x512xf32>
    %5 = arith.subf %3, %4 : vector<8x512xf32>
    %6 = arith.mulf %5, %5 : vector<8x512xf32>
    %c1_i32 = arith.constant 1 : i32
    %7 = arith.muli %arg0, %c1_i32 : i32
    %8 = arith.addi %7, %arg1 : i32
    %c8_i32 = arith.constant 8 : i32
    %9 = arith.muli %8, %c8_i32 : i32
    %10 = tpu.iota {dimensions = array<i32: 0>} : vector<8x512xi32>
    %11 = vector.broadcast %9 : i32 to vector<8x512xi32>
    %12 = arith.addi %11, %10 : vector<8x512xi32>
    %c1_i32_4 = arith.constant 1 : i32
    %13 = vector.broadcast %c1_i32_4 : i32 to vector<8x512xi32>
    %14 = arith.cmpi slt, %12, %13 : vector<8x512xi32>
    %cst = arith.constant 0.000000e+00 : f32
    %15 = vector.broadcast %cst : f32 to vector<8x512xf32>
    %16 = arith.select %14, %6, %15 : vector<8x512xi1>, vector<8x512xf32>
    %c0_5 = arith.constant 0 : index
    %c0_6 = arith.constant 0 : index
    %17 = vector.load %arg5[%c0_5, %c0_6] : memref<8x512xf32, #tpu.memory_space<vmem>>, vector<8x512xf32>
    %18 = vector.shape_cast %16 : vector<8x512xf32> to vector<1x8x512xf32>
    %cst_7 = arith.constant dense<0.000000e+00> : vector<8x512xf32>
    %19 = vector.multi_reduction <add>, %18, %cst_7 [0] : vector<1x8x512xf32> to vector<8x512xf32>
    %20 = arith.addf %17, %19 : vector<8x512xf32>
    %c0_8 = arith.constant 0 : index
    %c0_9 = arith.constant 0 : index
    %21 = vector.load %arg5[%c0_8, %c0_9] : memref<8x512xf32, #tpu.memory_space<vmem>>, vector<8x512xf32>
    tpu.vector_store %arg5[%c0_8, %c0_9], %20 {strides = array<i32>} : memref<8x512xf32, #tpu.memory_space<vmem>>, vector<8x512xf32>,
    %c0_i32_10 = arith.constant 0 : i32
    %22 = arith.cmpi eq, %arg1, %c0_i32_10 : i32
    %23 = arith.extui %22 : i1 to i32
    %c0_i32_11 = arith.constant 0 : i32
    %24 = arith.cmpi ne, %23, %c0_i32_11 : i32
    scf.if %24 {
      %c0_12 = arith.constant 0 : index
      %c0_13 = arith.constant 0 : index
      %25 = vector.load %arg5[%c0_12, %c0_13] : memref<8x512xf32, #tpu.memory_space<vmem>>, vector<8x512xf32>
      %26 = vector.shape_cast %25 : vector<8x512xf32> to vector<1x8x512xf32>
      %cst_14 = arith.constant dense<0.000000e+00> : vector<1xf32>
      %27 = vector.multi_reduction <add>, %26, %cst_14 [1, 2] : vector<1x8x512xf32> to vector<1xf32>
      %28 = vector.shape_cast %27 : vector<1xf32> to vector<1x1x1xf32>
      %29 = vector.extract %28[0, 0, 0] : f32 from vector<1x1x1xf32>
      %cst_15 = arith.constant 0.001953125 : f32
      %30 = arith.mulf %29, %cst_15 : f32
      %31 = tpu.iota {dimensions = array<i32: 1>} : vector<1x128xi32>
      %c0_i32_16 = arith.constant 0 : i32
      %32 = vector.broadcast %c0_i32_16 : i32 to vector<1x128xi32>
      %33 = arith.cmpi eq, %31, %32 : vector<1x128xi32>
      %cst_17 = arith.constant 0.000000e+00 : f32
      %34 = vector.broadcast %30 : f32 to vector<1x128xf32>
      %35 = vector.broadcast %cst_17 : f32 to vector<1x128xf32>
      %36 = arith.select %33, %34, %35 : vector<1x128xi1>, vector<1x128xf32>
      %c0_18 = arith.constant 0 : index
      %c0_19 = arith.constant 0 : index
      %37 = vector.load %arg4[%c0_18, %c0_19] : memref<1x128xf32, #tpu.memory_space<vmem>>, vector<1x128xf32>
      tpu.vector_store %arg4[%c0_18, %c0_19], %36 {strides = array<i32>} : memref<1x128xf32, #tpu.memory_space<vmem>>, vector<1x128xf32>,
    } else {
    }
    return
  }
  func.func @transform_0(%arg0: i32, %arg1: i32) -> (i32, i32) {
    %c1_i32 = arith.constant 1 : i32
    %0 = arith.muli %arg0, %c1_i32 : i32
    %1 = arith.addi %0, %arg1 : i32
    %c0_i32 = arith.constant 0 : i32
    %2 = arith.minsi %1, %c0_i32 : i32
    %c0_i32_0 = arith.constant 0 : i32
    %c0_i32_1 = arith.constant 0 : i32
    return %2, %c0_i32_0 : i32, i32
  }
  func.func @transform_1(%arg0: i32, %arg1: i32) -> (i32, i32) {
    %c1_i32 = arith.constant 1 : i32
    %0 = arith.muli %arg0, %c1_i32 : i32
    %1 = arith.addi %0, %arg1 : i32
    %c0_i32 = arith.constant 0 : i32
    %2 = arith.minsi %1, %c0_i32 : i32
    %c0_i32_0 = arith.constant 0 : i32
    %c0_i32_1 = arith.constant 0 : i32
    return %2, %c0_i32_0 : i32, i32
  }
  func.func @transform_2(%arg0: i32, %arg1: i32) -> (i32, i32) {
    %c0_i32 = arith.constant 0 : i32
    %c0_i32_0 = arith.constant 0 : i32
    return %c0_i32, %arg0 : i32, i32
  }
}

</mosaic_0001>

<bundles_post_ra>
// kernel: tpu_custom_call.1
= control target key start
LH: loop header
LB: loop body
LE: loop exit
PB: predicated region body
PF: predicated region fallthrough
CT: control target
= control target key end

     0   :  { %7 = vsyncpa [#allocation4], 0  ;;  %s962_s0 = inlined_call_operand.hbm [shape: f32[1,512], index: 0, kind: input, shape index: {}]   ;;  %s963_s1 = inlined_call_operand.hbm [shape: f32[1,512], index: 1, kind: input, shape index: {}]   ;;  %s964_s2 = inlined_call_operand.hbm [shape: f32[1,256], index: 2, kind: output, shape index: {}]  }
   0x1   :  { %9 = vsyncpa [#allocation4 + $0x1], 0 }
   0x2   :  { %10 = vsyncpa [#allocation7], 0 }
   0x3   :  { %12 = vsyncpa [#allocation7 + $0x1], 0 }
   0x4   :  { %13 = vsyncpa [#allocation5], 0 }
   0x5   :  { %15 = vsyncpa [#allocation5 + $0x1], 0  ;;  %s816_s9 = smov 0   ;;  %s818_s10 = smov 0  }
   0x6   :  { %s820_s11 = smov 0   ;;  %s822_s12 = smov 0  }
   0x7   :  { %s824_s13 = smov 0   ;;  %s826_s14 = smov 0  }
   0x8   :  { %s828_s15 = smov 0   ;;  %s830_s16 = smov 0  }
   0x9 LB: > { %s491_s17 = sadd.s32 4294967295, %s793_s16   ;;  %s492_s18 = sadd.s32 4294967294, %s793_s16   ;;  %s793_s16 = sphi %s830_s16, %s21_s16   ;;  %s789_s15 = sphi %s828_s15, %s974_s15   ;;  %s785_s14 = sphi %s826_s14, %s973_s14   ;;  %s781_s13 = sphi %s824_s13, %s952_s13   ;;  %s777_s12 = sphi %s822_s12, %s972_s12   ;;  %s773_s11 = sphi %s820_s11, %s971_s11   ;;  %s769_s10 = sphi %s818_s10, %s970_s10   ;;  %s765_s9 = sphi %s816_s9, %s969_s9  }
   0xa   : > { %s33_s19 = sadd.s32 1, %s789_s15  ;;  %p762_p1 = scmp.ne.s32.totalorder %s781_s13, 0 }
   0xb   : > { %p35_p0 = scmp.ge.s32.totalorder %s33_s19, 2  ;;  %p54_p2 = scmp.eq.s32.totalorder %s793_s16, 0 }
   0xc   : > { %p59_p3 = scmp.ne.s32.totalorder %s781_s13, %s777_s12  ;;  %p60_p5 = scmp.eq.s32.totalorder %s491_s17, 0 }
   0xd   : > { %s976_s19 = smov (%p35_p0, %s33_s19), 0  ;;  %p862_p4 = por %p762_p1, %p54_p2 }
   0xe   : > { %p866_p6 = por %p60_p5, %p59_p3  ;;  %s101_s22 = ssub.s32 %s789_s15, %s976_s19 }
   0xf   : > { %p102_p7 = scmp.eq.s32.totalorder %s101_s22, 0  ;;  %s104_s23 = sadd.s32 1, %s773_s11 }
  0x10   : > { %p114_p8 = scmp.ne.s32.totalorder %s773_s11, %s769_s10  ;;  %p115_p9 = scmp.eq.s32.totalorder %s491_s17, 1 }
  0x11   : > { %s874_s24 = scalar_select %p102_p7, %s773_s11, %s104_s23  }
  0x12   : > { %p120_p10 = scmp.ne.s32.totalorder %s769_s10, %s765_s9  ;;  %p121_p11 = scmp.eq.s32.totalorder %s492_s18, 1 }
  0x13   : > { %p880_p12 = por %p115_p9, %p114_p8  ;;  %p494_p0 = scmp.ge.s32.totalorder %s793_s16, 2 }
  0x14   : > { %p884_p13 = por %p121_p11, %p120_p10 }
  0x15   : > { %137 = sbr.rel (%p494_p0) target bundleno = 70 (0x46), region = 16 }
  0x1a   : > { %140 = sbr.rel (!%p862_p4) target bundleno = 48 (0x30), region = 20 }
  0x1f   : > { %154 = vsyncadd [#allocation4], 448  ;;  %s795_s27 = smov [#allocation3]   ;;  %s159_s3 = sshll.u32 %s962_s0, 4  ;;  %s160_s3 = int_to_ptr.hbm [resolvable:$true] %s159_s3 }
  0x20   : > { %s161_s28 = sshll.u32 %s795_s27, 4  ;;  %s604_s4 = sshra.s32 %s160_s3, 4  ;;  %s162_s28 = int_to_ptr.vmem [resolvable:$true] %s161_s28  ;;  %s605_s4 = int_to_ptr.hbm [resolvable:$true] %s604_s4 }
  0x21   : > { %s611_s5 = scalar_lea.hbm %s605_s4, 4  ;;  %s615_s8 = scalar_lea.hbm %s962_s0, 4 }
  0x22   : > { %p612_p1 = scmp.ne.s32.totalorder %s605_s4, %s611_s5  ;;  %p617_p2 = scmp.lt.s32.totalorder %s615_s8, %s611_s5 }
  0x24   : > { %p619_p3 = pnand %p617_p2, %p612_p1 }
  0x26   : > { %622 = shalt.err (!%p619_p3)
}
  0x27   : > { %s623_s12 = sshra.s32 %s162_s28, 4  ;;  %s634_s18 = scalar_lea.vmem %s795_s27, 64  ;;  %s624_s12 = int_to_ptr.vmem [resolvable:$true] %s623_s12 }
  0x28   : > { %s630_s17 = scalar_lea.vmem %s624_s12, 4 }
  0x29   : > { %p631_p5 = scmp.ne.s32.totalorder %s624_s12, %s630_s17  ;;  %p636_p7 = scmp.lt.s32.totalorder %s634_s18, %s630_s17 }
  0x2b   : > { %p638_p8 = pnand %p636_p7, %p631_p5 }
  0x2d   : > { %641 = shalt.err (!%p638_p8)
}
  0x2e   : > { %s796_s22 = smov 64   ;;  %s797_s23 = smov 4  }
  0x2f   : > { %167 = dma.hbm_to_vmem [thread:$0]  %s160_s3, 64, %s162_s28, [#allocation4], %s796_s22, %s796_s22, %s797_s23  }
  0x30 PF: > { %170 = sbr.rel (!%p862_p4) target bundleno = 70 (0x46), region = 24 }
  0x35   : > { %184 = vsyncadd [#allocation7], 448  ;;  %s798_s29 = smov [#allocation6]   ;;  %s189_s6 = sshll.u32 %s963_s1, 4  ;;  %s190_s6 = int_to_ptr.hbm [resolvable:$true] %s189_s6 }
  0x36   : > { %s191_s30 = sshll.u32 %s798_s29, 4  ;;  %s643_s27 = sshra.s32 %s190_s6, 4  ;;  %s192_s30 = int_to_ptr.vmem [resolvable:$true] %s191_s30  ;;  %s644_s27 = int_to_ptr.hbm [resolvable:$true] %s643_s27 }
  0x37   : > { %s650_s7 = scalar_lea.hbm %s644_s27, 4  ;;  %s654_s28 = scalar_lea.hbm %s963_s1, 4 }
  0x38   : > { %p651_p9 = scmp.ne.s32.totalorder %s644_s27, %s650_s7  ;;  %p656_p10 = scmp.lt.s32.totalorder %s654_s28, %s650_s7 }
  0x3a   : > { %p658_p11 = pnand %p656_p10, %p651_p9 }
  0x3c   : > { %661 = shalt.err (!%p658_p11)
}
  0x3d   : > { %s662_s20 = sshra.s32 %s192_s30, 4  ;;  %s673_s17 = scalar_lea.vmem %s798_s29, 64  ;;  %s663_s20 = int_to_ptr.vmem [resolvable:$true] %s662_s20 }
  0x3e   : > { %s669_s3 = scalar_lea.vmem %s663_s20, 4 }
  0x3f   : > { %p670_p4 = scmp.ne.s32.totalorder %s663_s20, %s669_s3  ;;  %p675_p1 = scmp.lt.s32.totalorder %s673_s17, %s669_s3 }
  0x41   : > { %p677_p2 = pnand %p675_p1, %p670_p4 }
  0x43   : > { %680 = shalt.err (!%p677_p2)
}
  0x44   : > { %s799_s18 = smov 64   ;;  %s800_s22 = smov 4  }
  0x45   : > { %197 = dma.hbm_to_vmem [thread:$0]  %s190_s6, 64, %s192_s30, [#allocation7], %s799_s18, %s799_s18, %s800_s22  }
  0x46 PF: > { %p509_p3 = scmp.ge.s32.totalorder %s793_s16, 1  ;;  %p199_p5 = scmp.lt.s32.totalorder %s793_s16, 3 }
  0x48   : > { %p200_p7 = pnand %p509_p3, %p199_p5 }
  0x49   : > { %s205_s23 = sand.u32 (!%p200_p7), 1, %s781_s13  }
  0x4a   : > { %203 = sbr.rel (%p200_p7) target bundleno = 297 (0x129), region = 28  ;;  %s510_s4 = sshll.u32 (!%p200_p7), %s205_s23, 5 }
  0x4b   : > { %s206_s5 = scalar_lea.sflag (!%p200_p7), [#allocation4], %s205_s23  ;;  %s209_s29 = scalar_lea.vmem (!%p200_p7), [#allocation3], %s510_s4 }
  0x4f   : > { %747 = dma.done.wait (%p866_p6), %s206_s5, 512  }
  0x50   : > { %749 = vsyncadd (%p866_p6), %s206_s5, 4294966784  ;;  %s216_s30 = scalar_lea.sflag [#allocation7], %s205_s23  ;;  %s219_s6 = scalar_lea.vmem [#allocation6], %s510_s4 }
  0x51   : > { %751 = dma.done.wait (%p866_p6), %s216_s30, 512  }
  0x52   : > { %753 = vsyncadd (%p866_p6), %s216_s30, 4294966784  ;;  %v265_v0 = vld [vmem:[%s209_s29] sm:$0xf]  ;;  %v266_v1 = vld [vmem:[%s209_s29 + $0x4] sm:$0xf]  ;;  %v299_v29 = vlaneseq  ;;  %s512_s21 = sshll.u32 %s785_s14, 3  ;;  %s390_s12 = scalar_lea.hbm %s964_s2, %s785_s14 }
  0x53   : > { %v267_v2 = vld [vmem:[%s209_s29 + $0x8] sm:$0xf]  ;;  %v268_v3 = vld [vmem:[%s209_s29 + $0xc] sm:$0xf]  ;;  %v269_v4 = vld [vmem:[%s209_s29 + $0x10] sm:$0xf]  ;;  %v301_v34 = vstv %s512_s21 }
  0x54   : > { %v270_v5 = vld [vmem:[%s209_s29 + $0x14] sm:$0xf]  ;;  %v271_v6 = vld [vmem:[%s209_s29 + $0x18] sm:$0xf]  ;;  %v272_v7 = vld [vmem:[%s209_s29 + $0x1c] sm:$0xf] }
  0x55   : > { %v273_v8 = vld [vmem:[%s219_s6] sm:$0xf]  ;;  %v274_v9 = vld [vmem:[%s219_s6 + $0x4] sm:$0xf]  ;;  %v275_v10 = vld [vmem:[%s219_s6 + $0x8] sm:$0xf] }
  0x56   : > { %v276_v11 = vld [vmem:[%s219_s6 + $0xc] sm:$0xf]  ;;  %v281_v12 = vsub.f32 %v265_v0, %v273_v8  ;;  %v277_v13 = vld [vmem:[%s219_s6 + $0x10] sm:$0xf]  ;;  %v278_v14 = vld [vmem:[%s219_s6 + $0x14] sm:$0xf]  ;;  %v282_v16 = vsub.f32 %v266_v1, %v274_v9  ;;  %v283_v17 = vsub.f32 %v267_v2, %v275_v10 }
  0x57   : > { %v279_v15 = vld [vmem:[%s219_s6 + $0x18] sm:$0xf]  ;;  %v284_v18 = vsub.f32 %v268_v3, %v276_v11  ;;  %v280_v19 = vld [vmem:[%s219_s6 + $0x1c] sm:$0xf]  ;;  %v285_v20 = vsub.f32 %v269_v4, %v277_v13  ;;  %v286_v21 = vsub.f32 %v270_v5, %v278_v14  ;;  %v300_v33 = vshrl.u32 %v299_v29, 7  ;;  %s243_s27 = sand.u32 1, %s769_s10  }
  0x58   : > { %v287_v22 = vsub.f32 %v271_v6, %v279_v15  ;;  %v289_v23 = vmul.f32 %v281_v12, %v281_v12  ;;  %v288_v24 = vsub.f32 %v272_v7, %v280_v19  ;;  %v290_v25 = vmul.f32 %v282_v16, %v282_v16  ;;  %s244_s28 = scalar_lea.vmem [#allocation8], %s243_s27  ;;  %s394_s17 = sshll.u32 %s390_s12, 4  ;;  %s395_s17 = int_to_ptr.hbm [resolvable:$true] %s394_s17 }
  0x59   : > { %v291_v26 = vmul.f32 %v283_v17, %v283_v17  ;;  %v292_v27 = vmul.f32 %v284_v18, %v284_v18  ;;  %v293_v28 = vmul.f32 %v285_v20, %v285_v20  ;;  %v294_v30 = vmul.f32 %v286_v21, %v286_v21  ;;  %s392_s20 = sshll.u32 %s244_s28, 4  ;;  %s382_s22 = scalar_lea.sflag [#allocation5], %s243_s27  ;;  %s393_s20 = int_to_ptr.vmem [resolvable:$true] %s392_s20 }
  0x5a   : > { %312 = vst [vmem:[#allocation1] ss:$9 sm:$0xff] %v289_v23  ;;  %v295_v31 = vmul.f32 %v287_v22, %v287_v22  ;;  %v296_v32 = vmul.f32 %v288_v24, %v288_v24  ;;  %v302_v35 = vadd.s32 %v301_v34, %v300_v33  ;;  %v376_v54 = vand.u32 127, %v299_v29  ;;  %s696_s23 = sshra.s32 %s395_s17, 4  ;;  %s702_s29 = scalar_lea.hbm %s964_s2, 2  ;;  %s697_s23 = int_to_ptr.hbm [resolvable:$true] %s696_s23 }
  0x5b   : > { %314 = vst [vmem:[#allocation1 + $0x1] ss:$9 sm:$0xff] %v290_v25  ;;  %s698_s4 = scalar_lea.hbm %s697_s23, 1  ;;  %p703_p10 = scmp.lt.s32.totalorder %s697_s23, %s964_s2 }
  0x5c   : > { %316 = vst [vmem:[#allocation1 + $0x2] ss:$9 sm:$0xff] %v291_v26  ;;  %vm303_vm0 = vcmp.lt.s32.totalorder %v302_v35, 1  ;;  %vm377_vm1 = vcmp.eq.s32.totalorder %v376_v54, 0  ;;  %p699_p6 = scmp.ne.s32.totalorder %s697_s23, %s698_s4  ;;  %p704_p11 = scmp.lt.s32.totalorder %s702_s29, %s698_s4 }
  0x5d   : > { %318 = vst [vmem:[#allocation1 + $0x3] ss:$9 sm:$0xff] %v292_v27 }
  0x5e   : > { %320 = vst [vmem:[#allocation1 + $0x4] ss:$9 sm:$0xff] %v293_v28  ;;  %p700_p8 = pnand %p699_p6, %p880_p12  ;;  %p705_p4 = por %p704_p11, %p703_p10 }
  0x5f   : > { %322 = vst [vmem:[#allocation1 + $0x5] ss:$9 sm:$0xff] %v294_v30 }
  0x60   : > { %324 = vst [vmem:[#allocation1 + $0x6] ss:$9 sm:$0xff] %v295_v31  ;;  %p701_p9 = pneg %p700_p8 }
  0x61   : > { %326 = vst [vmem:[#allocation1 + $0x7] ss:$9 sm:$0xff] %v296_v32 }
  0x62   : > { %p706_p1 = pnand %p705_p4, %p701_p9 }
  0x68   : > { %v327_v36 = vld [vmem:[#allocation1] sm:$0xff]  ;;  %v328_v37 = vld [vmem:[#allocation1 + $0x9] sm:$0xff]  ;;  %v329_v38 = vld [vmem:[#allocation1 + $0x12] sm:$0xff] }
  0x69   : > { %v330_v39 = vld [vmem:[#allocation1 + $0x1b] sm:$0xff]  ;;  %v335_v40 = vsel %vm303_vm0, %v327_v36, 0.0  ;;  %v336_v41 = vsel %vm303_vm0, %v328_v37, 0.0  ;;  %v337_v42 = vsel %vm303_vm0, %v329_v38, 0.0 }
  0x6a   : > { %v362_v43 = vadd.f32 %v336_v41, %v335_v40  ;;  %v338_v44 = vsel %vm303_vm0, %v330_v39, 0.0 }
  0x6c   : > { %v363_v45 = vadd.f32 %v362_v43, %v337_v42 }
  0x6e   : > { %v364_v46 = vadd.f32 %v363_v45, %v338_v44 }
  0x70   : > { %365 = vadd.xlane.f32.xlu0 %v364_v46 }
  0xe3   : > { %v366_v47 = vpop.xlane.xlu0 %365 }
  0xe4   : > { %v367_v48 = vrot.slane %v366_v47, 4 }
  0xe6   : > { %v368_v49 = vadd.f32 %v367_v48, %v366_v47 }
  0xe8   : > { %v369_v50 = vrot.slane %v368_v49, 2 }
  0xea   : > { %v370_v51 = vadd.f32 %v369_v50, %v368_v49 }
  0xec   : > { %v371_v52 = vrot.slane %v370_v51, 1 }
  0xee   : > { %v372_v53 = vadd.f32 %v371_v52, %v370_v51 }
  0xf0   : > { %517 = vpush %v372_v53 }
 0x121   : > { %s518_s3 = spop %517 }
 0x122   : > { %s374_s18 = smul.f32 0.001953125, %s518_s3 }
 0x124   : > { %v378_v55 = vstv %s374_s18 }
 0x125   : > { %v379_v56 = vsel %vm377_vm1, %v378_v55, 0.0 }
 0x126   : > { %380 = vst [vmem:[%s244_s28] sm:$0x1] %v379_v56 }
 0x127   : > { %709 = shalt.err (!%p706_p1)
}
 0x128   : > { %521 = dma.vmem_to_hbm [thread:$0]  (%p880_p12), %s393_s20, 16, %s395_s17, %s382_s22  }
 0x129 PF: > { %s406_s21 = sand.u32 1, %s765_s9   ;;  %p524_p2 = pnand %p494_p0, %p884_p13 }
 0x12a   : > { %s407_s27 = scalar_lea.sflag [#allocation5], %s406_s21 }
 0x12b   : > { %p525_p3 = pneg %p524_p2 }
 0x12d   : > { %755 = dma.done.wait (%p525_p3), %s407_s27, 16  }
 0x12e   : > { %757 = vsyncadd (%p525_p3), %s407_s27, 4294967280  ;;  %s21_s16 = sadd.s32 1, %s793_s16   ;;  %s969_s9 = smov %s769_s10 }
 0x12f   : > { %p18_p5 = scmp.ge.s32.totalorder %s21_s16, 4   ;;  %s970_s10 = smov %s773_s11 }
 0x130   : > { %s971_s11 = smov %s874_s24  ;;  %s972_s12 = smov %s781_s13 }
 0x131   : > { %s952_s13 = smov 0   ;;  %s973_s14 = smov %s789_s15 }
 0x132   : > { %s974_s15 = smov %s976_s19  ;;  %20 = sbr.rel (!%p18_p5) target bundleno = 9 (0x9), region = 101 }
 0x137   :  { %412 = vsyncpa [#allocation4], 1 }
 0x138   :  { %414 = vsyncpa [#allocation4 + $0x1], 1 }
 0x139   :  { %415 = vsyncpa [#allocation7], 1 }
 0x13a   :  { %417 = vsyncpa [#allocation7 + $0x1], 1 }
 0x13b   :  { %418 = vsyncpa [#allocation5], 1 }
 0x13c   :  { %420 = vsyncpa [#allocation5 + $0x1], 1 }

</bundles_post_ra>
